<compile_context>
chip_gen: v7x
topology: tpu7x:2x2x1
jax: 0.10.0
libtpu: 0.0.40
codegen_flags: <defaults>
</compile_context>

<pallas_src>
import functools

import jax
import jax.numpy as jnp
from jax.experimental import pallas as pl
from jax.experimental.pallas import tpu as pltpu


def _cdiv(a: int, b: int) -> int:
    return (a + b - 1) // b


def _nll_kernel(pred_ref, tgt_ref, out_ref, *, batch, block_rows,
                blocks_per_split, scale, fuse):
    # pred_ref: (TB, C) log-probs or logits (native dtype) in VMEM
    # tgt_ref:  (TB, 1) int32 class indices in VMEM
    # out_ref:  (8, 128) f32 per-split partial-sum block (resident across the
    #           reduction axis; private to this split -> no cross-core race)
    s = pl.program_id(0)          # split (parallel) axis
    b = pl.program_id(1)          # batch-block (reduction) axis

    @pl.when(b == 0)
    def _init():
        out_ref[...] = jnp.zeros_like(out_ref)

    # Native-dtype HBM read, upcast in-kernel (v5e has no bf16 VPU/EUP anyway).
    x = pred_ref[...].astype(jnp.float32)                         # (TB, C)

    # In-kernel ragged-tail mask (replaces the old wrapper jnp.pad, which cost
    # a full extra HBM read+write of pred).  Rows >= batch contribute 0.
    row0 = (s * blocks_per_split + b) * block_rows
    rows = row0 + jax.lax.broadcasted_iota(jnp.int32, (x.shape[0], 1), 0)
    valid = rows < batch                                          # (TB, 1)

    # One-hot gather of x[i, target[i]] via lane-iota compare (VPU) + a single
    # fused full-array reduce.  `where` is a select, so garbage tail data
    # (even NaN/Inf) never leaks into the sum.
    col = jax.lax.broadcasted_iota(jnp.int32, x.shape, 1)         # (TB, C)
    hit = (col == tgt_ref[...]) & valid                           # (TB, C)
    partial = jnp.sum(jnp.where(hit, x, 0.0))                     # scalar

    if fuse:
        # Optional fused log_softmax (no-op for already-normalized log-probs).
        # Accumulator identity: sum(x[i,t_i] - lse_i) = sum(x[i,t_i]) - sum(lse_i),
        # so no (TB, C) "x - lse" temporary is materialized.
        m = jnp.max(x, axis=1, keepdims=True)                     # (TB, 1)
        lse = m + jnp.log(jnp.sum(jnp.exp(x - m), axis=1, keepdims=True))
        partial = partial - jnp.sum(jnp.where(valid, lse, 0.0))

    out_ref[...] += partial                                       # scalar broadcast

    @pl.when(b == pl.num_programs(1) - 1)
    def _finalize():
        out_ref[...] = out_ref[...] * scale                       # scale = -1/B


def nll_loss_pallas(pred, target, trans_feat=None, *,
                    fuse_log_softmax=False, block_rows=None):
    """total_loss = F.nll_loss(pred, target)  (reduction='mean', no weight).

    `pred` is expected to hold log-probabilities (the get_loss contract).
    With fuse_log_softmax=True the kernel additionally folds a log_softmax
    over the class axis (idempotent for log-probs; fuses the upstream
    normalization for raw logits).  `trans_feat` is accepted and ignored.
    """
    del trans_feat  # not used by get_loss.forward
    B, C = pred.shape
    tgt2d = target.astype(jnp.int32).reshape(B, 1)

    itemsize = int(jnp.dtype(pred.dtype).itemsize)
    # Sublane packing: sub-32-bit dtypes pack 16 (bf16) / 32 (int8) rows/vreg.
    sub = {4: 8, 2: 16, 1: 32}.get(itemsize, 8)

    if block_rows is None:
        # Largest row tile keeping the double-buffered pred tile ~<= 8 MiB.
        tb = (8 * 1024 * 1024) // (2 * C * itemsize)
        tb = min(tb, 16384)
    else:
        tb = int(block_rows)

    if tb >= B:
        tb, nb = B, 1                       # single full-extent block
    else:
        tb = max(sub, (tb // sub) * sub)
        nb = _cdiv(B, tb)

    # 2-way split over a leading "parallel" axis: on v7x each TensorCore owns
    # a private partial-sum block; on single-core chips it runs sequentially
    # at negligible cost.  Only used when it divides the block count evenly.
    n_split = 2 if (nb >= 2 and nb % 2 == 0) else 1
    nbps = nb // n_split

    kernel = functools.partial(
        _nll_kernel, batch=B, block_rows=tb, blocks_per_split=nbps,
        scale=-1.0 / float(B), fuse=bool(fuse_log_softmax))

    cost = pl.CostEstimate(
        flops=4 * B * C,
        transcendentals=(2 * B * C) if fuse_log_softmax else 0,
        bytes_accessed=B * C * itemsize + B * 4 + n_split * 8 * 128 * 4)

    out = pl.pallas_call(
        kernel,
        out_shape=jax.ShapeDtypeStruct((8, 128 * n_split), jnp.float32),
        grid_spec=pltpu.PrefetchScalarGridSpec(
            num_scalar_prefetch=0,
            grid=(n_split, nbps),
            in_specs=[
                pl.BlockSpec((tb, C), lambda s, b: (s * nbps + b, 0)),  # pred
                pl.BlockSpec((tb, 1), lambda s, b: (s * nbps + b, 0)),  # target
            ],
            out_specs=pl.BlockSpec((8, 128), lambda s, b: (0, s)),      # per-split
        ),
        compiler_params=pltpu.CompilerParams(
            dimension_semantics=("parallel", "arbitrary")),
        cost_estimate=cost,
    )(pred, tgt2d)

    # Each split's (8,128) block holds its (already -1/B scaled) partial in
    # every element; pick one element per split block and add.
    return jnp.sum(out[0, ::128])


if __name__ == "__main__":
    key = jax.random.PRNGKey(0)
    k1, k2, k3, k4, k5, k6 = jax.random.split(key, 6)

    # Canonical PointNet2 classification shapes: batch=8, 40 classes.
    B, C = 8, 40
    logits = jax.random.normal(k1, (B, C), dtype=jnp.float32)
    target = jax.random.randint(k2, (B,), 0, C, dtype=jnp.int32)
    trans_feat = jnp.zeros((B, 3, 3), jnp.float32)       # unused by the loss

    log_probs = jax.nn.log_softmax(logits, axis=-1)
    ref = -jnp.mean(log_probs[jnp.arange(B), target])

    # 1) Exact module semantics: F.nll_loss on precomputed log-probs (default path).
    loss_exact = jax.block_until_ready(nll_loss_pallas(log_probs, target, trans_feat))
    assert jnp.allclose(loss_exact, ref, atol=1e-6, rtol=1e-6), (loss_exact, ref)

    # 2) Fused path: raw logits in, log_softmax folded into the kernel.
    loss_fused = jax.block_until_ready(
        nll_loss_pallas(logits, target, trans_feat, fuse_log_softmax=True))
    assert jnp.allclose(loss_fused, ref, atol=1e-5, rtol=1e-5), (loss_fused, ref)

    # 3) Native-bf16 read (no wrapper cast), upcast inside the kernel.
    loss_bf16 = jax.block_until_ready(
        nll_loss_pallas(log_probs.astype(jnp.bfloat16), target, trans_feat))
    assert jnp.allclose(loss_bf16, ref, atol=5e-2, rtol=5e-2), (loss_bf16, ref)

    # 4) Tiled path with a ragged tail (no wrapper pad; in-kernel row mask).
    B2 = 36
    logits2 = jax.random.normal(k3, (B2, C), dtype=jnp.float32)
    target2 = jax.random.randint(k4, (B2,), 0, C, dtype=jnp.int32)
    lp2 = jax.nn.log_softmax(logits2, axis=-1)
    ref2 = -jnp.mean(lp2[jnp.arange(B2), target2])
    loss_tiled = jax.block_until_ready(
        nll_loss_pallas(lp2, target2, None, block_rows=8))
    assert jnp.allclose(loss_tiled, ref2, atol=1e-5, rtol=1e-5), (loss_tiled, ref2)

    # 5) Split path (2-way parallel leading axis with per-split partial blocks).
    B3 = 64
    logits3 = jax.random.normal(k5, (B3, C), dtype=jnp.float32)
    target3 = jax.random.randint(k6, (B3,), 0, C, dtype=jnp.int32)
    lp3 = jax.nn.log_softmax(logits3, axis=-1)
    ref3 = -jnp.mean(lp3[jnp.arange(B3), target3])
    loss_split = jax.block_until_ready(
        nll_loss_pallas(lp3, target3, None, block_rows=16))
    assert jnp.allclose(loss_split, ref3, atol=1e-5, rtol=1e-5), (loss_split, ref3)

    print("KERNEL_OK")
</pallas_src>

<mosaic_0001>
module attributes {stable_mosaic.version = 11 : i64} {
  func.func @_nll_kernel(%arg0: i32, %arg1: i32, %arg2: memref<8x40xf32, #tpu.memory_space<vmem>>, %arg3: memref<8x1xi32, #tpu.memory_space<vmem>>, %arg4: memref<8x128xf32, #tpu.memory_space<vmem>>) attributes {dimension_semantics = [#tpu.dimension_semantics<parallel>, #tpu.dimension_semantics<arbitrary>], iteration_bounds = array<i64: 1, 1>, scalar_prefetch = 0 : i64, scratch_operands = 0 : i64, tpu.core_type = #tpu.core_type<tc>, window_params = [{transform_indices = @transform_0, window_bounds = array<i64: 8, 40>}, {transform_indices = @transform_1, window_bounds = array<i64: 8, 1>}, {transform_indices = @transform_2, window_bounds = array<i64: 8, 128>}]} {
    %c0_i32 = arith.constant 0 : i32
    %0 = arith.cmpi eq, %arg1, %c0_i32 : i32
    %1 = arith.extui %0 : i1 to i32
    %c0_i32_0 = arith.constant 0 : i32
    %2 = arith.cmpi ne, %1, %c0_i32_0 : i32
    scf.if %2 {
      %cst_12 = arith.constant 0.000000e+00 : f32
      %31 = vector.broadcast %cst_12 : f32 to vector<8x128xf32>
      %c0_13 = arith.constant 0 : index
      %c0_14 = arith.constant 0 : index
      %32 = vector.load %arg4[%c0_13, %c0_14] : memref<8x128xf32, #tpu.memory_space<vmem>>, vector<8x128xf32>
      tpu.vector_store %arg4[%c0_13, %c0_14], %31 {strides = array<i32>} : memref<8x128xf32, #tpu.memory_space<vmem>>, vector<8x128xf32>,
    } else {
    }
    %c0 = arith.constant 0 : index
    %c0_1 = arith.constant 0 : index
    %3 = vector.load %arg2[%c0, %c0_1] : memref<8x40xf32, #tpu.memory_space<vmem>>, vector<8x40xf32>
    %c1_i32 = arith.constant 1 : i32
    %4 = arith.muli %arg0, %c1_i32 : i32
    %5 = arith.addi %4, %arg1 : i32
    %c8_i32 = arith.constant 8 : i32
    %6 = arith.muli %5, %c8_i32 : i32
    %7 = tpu.iota {dimensions = array<i32: 0>} : vector<8x1xi32>
    %8 = vector.broadcast %6 : i32 to vector<8x1xi32>
    %9 = arith.addi %8, %7 : vector<8x1xi32>
    %c8_i32_2 = arith.constant 8 : i32
    %10 = vector.broadcast %c8_i32_2 : i32 to vector<8x1xi32>
    %11 = arith.cmpi slt, %9, %10 : vector<8x1xi32>
    %12 = tpu.iota {dimensions = array<i32: 1>} : vector<8x40xi32>
    %c0_3 = arith.constant 0 : index
    %c0_4 = arith.constant 0 : index
    %13 = vector.load %arg3[%c0_3, %c0_4] : memref<8x1xi32, #tpu.memory_space<vmem>>, vector<8x1xi32>
    %14 = vector.broadcast %13 : vector<8x1xi32> to vector<8x40xi32>
    %15 = arith.cmpi eq, %12, %14 : vector<8x40xi32>
    %16 = vector.broadcast %11 : vector<8x1xi1> to vector<8x40xi1>
    %17 = arith.andi %15, %16 : vector<8x40xi1>
    %cst = arith.constant 0.000000e+00 : f32
    %18 = vector.broadcast %cst : f32 to vector<8x40xf32>
    %19 = arith.select %17, %3, %18 : vector<8x40xi1>, vector<8x40xf32>
    %20 = vector.shape_cast %19 : vector<8x40xf32> to vector<1x8x40xf32>
    %cst_5 = arith.constant dense<0.000000e+00> : vector<1xf32>
    %21 = vector.multi_reduction <add>, %20, %cst_5 [1, 2] : vector<1x8x40xf32> to vector<1xf32>
    %22 = vector.shape_cast %21 : vector<1xf32> to vector<1x1x1xf32>
    %23 = vector.extract %22[0, 0, 0] : f32 from vector<1x1x1xf32>
    %c0_6 = arith.constant 0 : index
    %c0_7 = arith.constant 0 : index
    %24 = vector.load %arg4[%c0_6, %c0_7] : memref<8x128xf32, #tpu.memory_space<vmem>>, vector<8x128xf32>
    %25 = vector.broadcast %23 : f32 to vector<8x128xf32>
    %26 = arith.addf %24, %25 : vector<8x128xf32>
    %c0_8 = arith.constant 0 : index
    %c0_9 = arith.constant 0 : index
    %27 = vector.load %arg4[%c0_8, %c0_9] : memref<8x128xf32, #tpu.memory_space<vmem>>, vector<8x128xf32>
    tpu.vector_store %arg4[%c0_8, %c0_9], %26 {strides = array<i32>} : memref<8x128xf32, #tpu.memory_space<vmem>>, vector<8x128xf32>,
    %c0_i32_10 = arith.constant 0 : i32
    %28 = arith.cmpi eq, %arg1, %c0_i32_10 : i32
    %29 = arith.extui %28 : i1 to i32
    %c0_i32_11 = arith.constant 0 : i32
    %30 = arith.cmpi ne, %29, %c0_i32_11 : i32
    scf.if %30 {
      %c0_12 = arith.constant 0 : index
      %c0_13 = arith.constant 0 : index
      %31 = vector.load %arg4[%c0_12, %c0_13] : memref<8x128xf32, #tpu.memory_space<vmem>>, vector<8x128xf32>
      %cst_14 = arith.constant -1.250000e-01 : f32
      %32 = vector.broadcast %cst_14 : f32 to vector<8x128xf32>
      %33 = arith.mulf %31, %32 : vector<8x128xf32>
      %c0_15 = arith.constant 0 : index
      %c0_16 = arith.constant 0 : index
      %34 = vector.load %arg4[%c0_15, %c0_16] : memref<8x128xf32, #tpu.memory_space<vmem>>, vector<8x128xf32>
      tpu.vector_store %arg4[%c0_15, %c0_16], %33 {strides = array<i32>} : memref<8x128xf32, #tpu.memory_space<vmem>>, vector<8x128xf32>,
    } else {
    }
    return
  }
  func.func @transform_0(%arg0: i32, %arg1: i32) -> (i32, i32) {
    %c1_i32 = arith.constant 1 : i32
    %0 = arith.muli %arg0, %c1_i32 : i32
    %1 = arith.addi %0, %arg1 : i32
    %c0_i32 = arith.constant 0 : i32
    %c0_i32_0 = arith.constant 0 : i32
    return %1, %c0_i32 : i32, i32
  }
  func.func @transform_1(%arg0: i32, %arg1: i32) -> (i32, i32) {
    %c1_i32 = arith.constant 1 : i32
    %0 = arith.muli %arg0, %c1_i32 : i32
    %1 = arith.addi %0, %arg1 : i32
    %c0_i32 = arith.constant 0 : i32
    %c0_i32_0 = arith.constant 0 : i32
    return %1, %c0_i32 : i32, i32
  }
  func.func @transform_2(%arg0: i32, %arg1: i32) -> (i32, i32) {
    %c0_i32 = arith.constant 0 : i32
    %c0_i32_0 = arith.constant 0 : i32
    return %c0_i32, %arg0 : i32, i32
  }
}

</mosaic_0001>

<bundles_post_ra>
// kernel: tpu_custom_call.1
= control target key start
LH: loop header
LB: loop body
LE: loop exit
PB: predicated region body
PF: predicated region fallthrough
CT: control target
= control target key end

     0   :  { %s182_s0 = inlined_call_operand.vmem [shape: f32[8,40], index: 0, kind: input, shape index: {}]   ;;  %s183_s1 = inlined_call_operand.vmem [shape: s32[8,1], index: 1, kind: input, shape index: {}]   ;;  %s184_s2 = inlined_call_operand.hbm [shape: f32[8,128], index: 2, kind: output, shape index: {}]  }
   0x1   :  { %v61_v0 = vld [vmem:[%s183_s1] sm:$0xff] }
   0x2   :  { %7 = vsyncpa [#allocation3], 0  ;;  %v147_v1 = vmov 0   ;;  %v59_v2 = vlaneseq  ;;  %v51_v4 = vld [vmem:[%s182_s0] sm:$0xff]  ;;  %vm70_vm0 = vcmask 326656   ;;  %s148_s13 = smov [#allocation2]  }
   0x3   :  { %122 = vset.pattern.permute.xlu0 %v147_v1  ;;  %s97_s14 = sshll.u32 %s148_s13, 4  ;;  %s98_s14 = int_to_ptr.vmem [resolvable:$true] %s97_s14 }
   0x4   :  { %63 = vperm.xlu0 %122, %v61_v0   ;;  %v60_v3 = vand.u32 127, %v59_v2  ;;  %s123_s0 = scalar_lea.vmem %s98_s14, 128  ;;  %p128_p1 = scmp.lt.s32.totalorder %s98_s14, %s98_s14 }
   0x5   :  { %p124_p0 = scmp.ne.s32.totalorder %s98_s14, %s123_s0  ;;  %p129_p2 = scmp.lt.s32.totalorder %s123_s0, %s123_s0 }
   0x7   :  { %p130_p3 = por %p129_p2, %p128_p1 }
   0x9   :  { %p131_p4 = pnand %p130_p3, %p124_p0 }
  0x83   :  { %v64_v5 = vpop.permute.xlu0 %63 }
  0x84   :  { %vm65_vm1 = vcmp.eq.s32.totalorder %v60_v3, %v64_v5 }
  0x85   :  { %v69_v6 = vsel %vm65_vm1, %v51_v4, 0.0 }
  0x86   :  { %v71_v7 = vsel %vm70_vm0, %v69_v6, 0.0 }
  0x87   :  { %72 = vadd.xlane.f32.xlu0 %v71_v7 }
 0x114   :  { %v73_v8 = vpop.xlane.xlu0 %72 }
 0x115   :  { %v74_v9 = vrot.slane %v73_v8, 4 }
 0x117   :  { %v75_v10 = vadd.f32 %v74_v9, %v73_v8 }
 0x119   :  { %v76_v11 = vrot.slane %v75_v10, 2 }
 0x11b   :  { %v77_v12 = vadd.f32 %v76_v11, %v75_v10 }
 0x11d   :  { %v78_v13 = vrot.slane %v77_v12, 1 }
 0x11f   :  { %v79_v14 = vadd.f32 %v78_v13, %v77_v12 }
 0x121   :  { %117 = vpush %v79_v14 }
 0x152   :  { %s118_s1 = spop %117 }
 0x153   :  { %v82_v15 = vstv %s118_s1 }
 0x154   :  { %v89_v16 = vmul.f32 -0.125, %v82_v15 }
 0x156   :  { %90 = vst [vmem:[#allocation2] sm:$0xff] %v89_v16 }
 0x157   :  { %134 = shalt.err (!%p131_p4)
}
 0x158   :  { %s135_s17 = scalar_lea.hbm %s184_s2, 128 }
 0x159   :  { %p136_p5 = scmp.ne.s32.totalorder %s184_s2, %s135_s17  ;;  %p139_p6 = scmp.lt.u32.totalorder %s135_s17, %s184_s2 }
 0x15b   :  { %p141_p7 = pnand %p139_p6, %p136_p5 }
 0x15d   :  { %144 = shalt.err (!%p141_p7)
}
 0x15e   :  { %100 = dma.vmem_to_hbm [thread:$0]  %s98_s14, 128, %s184_s2, [#allocation3]  }
 0x15f   :  { %145 = dma.done.wait [#allocation3], 128  }
 0x160   :  { %146 = vsyncadd [#allocation3], 4294967168 }
 0x161   :  { %104 = vsyncpa [#allocation3], 1 }

</bundles_post_ra>
